<compile_context>
chip_gen: v7x
topology: tpu7x:2x2x1
jax: 0.10.0
libtpu: 0.0.40
codegen_flags: <defaults>
</compile_context>

<pallas_src>
import jax
import jax.numpy as jnp
from jax import lax
from jax.experimental import pallas as pl
from jax.experimental.pallas import tpu as pltpu


def _round_up(n, m):
    return ((n + m - 1) // m) * m


def _ffn_kernel(x_ref, w1_ref, w3_ref, w2_ref, o_ref, acc_ref):
    # x_ref : (tm, dim)   row tile of flattened activations
    # w1_ref: (th, dim)   gate proj slice  (PyTorch (out, in) layout)
    # w3_ref: (th, dim)   up   proj slice  (PyTorch (out, in) layout)
    # w2_ref: (dim, th)   down proj slice  (PyTorch (out, in) layout)
    # o_ref : (tm, dim)   output row tile (written on last hidden step)
    # acc_ref: (tm, dim)  f32 accumulator, resident across the hidden axis
    h = pl.program_id(1)

    @pl.when(h == 0)
    def _():
        acc_ref[...] = jnp.zeros_like(acc_ref)

    x = x_ref[...]
    # Contract the last dim of both operands (== x @ W^T); the MXU handles the
    # transposed layout natively, so no host-side weight transposes are needed.
    dn = (((1,), (1,)), ((), ()))
    gate = lax.dot_general(x, w1_ref[...], dn,
                           preferred_element_type=jnp.float32)
    up = lax.dot_general(x, w3_ref[...], dn,
                         preferred_element_type=jnp.float32)

    # SiLU(gate) * up in f32 (VPU multiplies, EUP sigmoid).
    gated = (gate * jax.nn.sigmoid(gate)) * up

    # Partial down projection for this hidden slice; accumulate in f32.
    acc_ref[...] += lax.dot_general(gated.astype(w2_ref.dtype), w2_ref[...],
                                    dn, preferred_element_type=jnp.float32)

    @pl.when(h == pl.num_programs(1) - 1)
    def _():
        o_ref[...] = acc_ref[...].astype(o_ref.dtype)


def feed_forward(x, w1, w2, w3, *, tm=256, th=512):
    """SwiGLU FFN: w2(silu(w1 x) * w3 x).

    x : (batch, seq, dim)
    w1: (hidden, dim), w3: (hidden, dim), w2: (dim, hidden)  [PyTorch (out,in)]
    """
    B, S, dim = x.shape
    hidden = w1.shape[0]
    M = B * S

    # ---- padded / tiled sizes (lane-dense, (8,128)-legal) ------------------
    dim_p = _round_up(dim, 128)
    th_eff = min(th, _round_up(hidden, 128))
    hidden_p = _round_up(hidden, th_eff)
    tm_eff = min(tm, _round_up(M, 8))
    m_p = _round_up(M, tm_eff)

    x2d = jnp.pad(x.reshape(M, dim), ((0, m_p - M), (0, dim_p - dim)))
    w1p = jnp.pad(w1, ((0, hidden_p - hidden), (0, dim_p - dim)))
    w3p = jnp.pad(w3, ((0, hidden_p - hidden), (0, dim_p - dim)))
    w2p = jnp.pad(w2, ((0, dim_p - dim), (0, hidden_p - hidden)))

    grid = (m_p // tm_eff, hidden_p // th_eff)

    # Rough per-call VMEM need (double-buffered tiles + f32 accumulator),
    # clamped so it is legal on every generation (<= 64 MiB physical on v7x).
    itm, wit = x.dtype.itemsize, w1.dtype.itemsize
    vmem_bytes = (2 * tm_eff * dim_p * itm            # x tile
                  + 2 * 2 * th_eff * dim_p * wit      # w1 + w3 tiles
                  + 2 * th_eff * dim_p * wit          # w2 tile
                  + 2 * tm_eff * dim_p * itm          # out tile
                  + tm_eff * dim_p * 4)               # f32 accumulator
    vmem_limit = int(min(max(vmem_bytes + (4 << 20), 32 << 20), 64 << 20))

    cost = pl.CostEstimate(
        flops=6 * M * dim * hidden,
        transcendentals=M * hidden,
        bytes_accessed=(2 * M * dim * itm + 3 * hidden * dim * wit),
    )

    out2d = pl.pallas_call(
        _ffn_kernel,
        out_shape=jax.ShapeDtypeStruct((m_p, dim_p), x.dtype),
        grid_spec=pltpu.PrefetchScalarGridSpec(
            num_scalar_prefetch=0,
            grid=grid,
            in_specs=[
                pl.BlockSpec((tm_eff, dim_p), lambda i, h: (i, 0)),   # x rows
                pl.BlockSpec((th_eff, dim_p), lambda i, h: (h, 0)),   # w1 slice
                pl.BlockSpec((th_eff, dim_p), lambda i, h: (h, 0)),   # w3 slice
                pl.BlockSpec((dim_p, th_eff), lambda i, h: (0, h)),   # w2 slice
            ],
            out_specs=pl.BlockSpec((tm_eff, dim_p), lambda i, h: (i, 0)),
            scratch_shapes=[pltpu.VMEM((tm_eff, dim_p), jnp.float32)],
        ),
        compiler_params=pltpu.CompilerParams(
            dimension_semantics=("parallel", "arbitrary"),
            vmem_limit_bytes=vmem_limit,
        ),
        cost_estimate=cost,
    )(x2d, w1p, w3p, w2p)

    return out2d[:M, :dim].reshape(B, S, dim)


def _compute_hidden_dim(dim, hidden_dim, multiple_of, ffn_dim_multiplier):
    hidden_dim = int(2 * hidden_dim / 3)
    if ffn_dim_multiplier is not None:
        hidden_dim = int(ffn_dim_multiplier * hidden_dim)
    hidden_dim = multiple_of * ((hidden_dim + multiple_of - 1) // multiple_of)
    return hidden_dim


if __name__ == "__main__":
    # Small config consistent with the PyTorch __init__ math.
    dim = 32
    hidden_dim_arg = 4 * dim
    multiple_of = 32
    ffn_dim_multiplier = None
    hidden = _compute_hidden_dim(dim, hidden_dim_arg, multiple_of,
                                 ffn_dim_multiplier)  # -> 96

    batch, seq = 2, 8

    key = jax.random.PRNGKey(0)
    kx, k1, k2, k3 = jax.random.split(key, 4)

    x = jax.random.normal(kx, (batch, seq, dim), dtype=jnp.float32)
    # nn.Linear weight shape is (out_features, in_features).
    w1 = jax.random.normal(k1, (hidden, dim), dtype=jnp.float32) * (1.0 / dim ** 0.5)
    w2 = jax.random.normal(k2, (dim, hidden), dtype=jnp.float32) * (1.0 / hidden ** 0.5)
    w3 = jax.random.normal(k3, (hidden, dim), dtype=jnp.float32) * (1.0 / dim ** 0.5)

    out = jax.block_until_ready(feed_forward(x, w1, w2, w3))

    # Pure-JAX reference (same math as the PyTorch forward).
    h1 = x @ w1.T
    h3 = x @ w3.T
    ref = (h1 * jax.nn.sigmoid(h1) * h3) @ w2.T

    assert out.shape == (batch, seq, dim)
    assert jnp.allclose(out, ref, atol=1e-4, rtol=1e-4), "mismatch vs reference"
    print("KERNEL_OK")
</pallas_src>

<mosaic_0001>
module attributes {stable_mosaic.version = 11 : i64} {
  func.func @_ffn_kernel(%arg0: i32, %arg1: i32, %arg2: memref<16x128xf32, #tpu.memory_space<vmem>>, %arg3: memref<128x128xf32, #tpu.memory_space<vmem>>, %arg4: memref<128x128xf32, #tpu.memory_space<vmem>>, %arg5: memref<128x128xf32, #tpu.memory_space<vmem>>, %arg6: memref<16x128xf32, #tpu.memory_space<vmem>>, %arg7: memref<16x128xf32, #tpu.memory_space<vmem>>) attributes {dimension_semantics = [#tpu.dimension_semantics<parallel>, #tpu.dimension_semantics<arbitrary>], iteration_bounds = array<i64: 1, 1>, scalar_prefetch = 0 : i64, scratch_operands = 1 : i64, tpu.core_type = #tpu.core_type<tc>, window_params = [{transform_indices = @transform_0, window_bounds = array<i64: 16, 128>}, {transform_indices = @transform_1, window_bounds = array<i64: 128, 128>}, {transform_indices = @transform_2, window_bounds = array<i64: 128, 128>}, {transform_indices = @transform_3, window_bounds = array<i64: 128, 128>}, {transform_indices = @transform_4, window_bounds = array<i64: 16, 128>}]} {
    %c0_i32 = arith.constant 0 : i32
    %0 = arith.cmpi eq, %arg1, %c0_i32 : i32
    %1 = arith.extui %0 : i1 to i32
    %c0_i32_0 = arith.constant 0 : i32
    %2 = arith.cmpi ne, %1, %c0_i32_0 : i32
    scf.if %2 {
      %cst_17 = arith.constant 0.000000e+00 : f32
      %23 = vector.broadcast %cst_17 : f32 to vector<16x128xf32>
      %c0_18 = arith.constant 0 : index
      %c0_19 = arith.constant 0 : index
      %24 = vector.load %arg7[%c0_18, %c0_19] : memref<16x128xf32, #tpu.memory_space<vmem>>, vector<16x128xf32>
      tpu.vector_store %arg7[%c0_18, %c0_19], %23 {strides = array<i32>} : memref<16x128xf32, #tpu.memory_space<vmem>>, vector<16x128xf32>,
    } else {
    }
    %c0 = arith.constant 0 : index
    %c0_1 = arith.constant 0 : index
    %3 = vector.load %arg2[%c0, %c0_1] : memref<16x128xf32, #tpu.memory_space<vmem>>, vector<16x128xf32>
    %c0_2 = arith.constant 0 : index
    %c0_3 = arith.constant 0 : index
    %4 = vector.load %arg3[%c0_2, %c0_3] : memref<128x128xf32, #tpu.memory_space<vmem>>, vector<128x128xf32>
    %cst = arith.constant dense<0.000000e+00> : vector<16x128xf32>
    %5 = tpu.matmul %3, %4, %cst {dimension_numbers = #tpu.dot_dimension_numbers<[1], [1], [0], [0], [0, 0, 1, 0], [], []>} : vector<16x128xf32>, vector<128x128xf32>, vector<16x128xf32> -> vector<16x128xf32>
    %c0_4 = arith.constant 0 : index
    %c0_5 = arith.constant 0 : index
    %6 = vector.load %arg4[%c0_4, %c0_5] : memref<128x128xf32, #tpu.memory_space<vmem>>, vector<128x128xf32>
    %cst_6 = arith.constant dense<0.000000e+00> : vector<16x128xf32>
    %7 = tpu.matmul %3, %6, %cst_6 {dimension_numbers = #tpu.dot_dimension_numbers<[1], [1], [0], [0], [0, 0, 1, 0], [], []>} : vector<16x128xf32>, vector<128x128xf32>, vector<16x128xf32> -> vector<16x128xf32>
    %8 = arith.negf %5 : vector<16x128xf32>
    %9 = math.exp %8 : vector<16x128xf32>
    %cst_7 = arith.constant 1.000000e+00 : f32
    %10 = vector.broadcast %cst_7 : f32 to vector<16x128xf32>
    %11 = arith.addf %10, %9 : vector<16x128xf32>
    %12 = arith.divf %10, %11 : vector<16x128xf32>
    %13 = arith.mulf %5, %12 : vector<16x128xf32>
    %14 = arith.mulf %13, %7 : vector<16x128xf32>
    %c0_8 = arith.constant 0 : index
    %c0_9 = arith.constant 0 : index
    %15 = vector.load %arg7[%c0_8, %c0_9] : memref<16x128xf32, #tpu.memory_space<vmem>>, vector<16x128xf32>
    %c0_10 = arith.constant 0 : index
    %c0_11 = arith.constant 0 : index
    %16 = vector.load %arg5[%c0_10, %c0_11] : memref<128x128xf32, #tpu.memory_space<vmem>>, vector<128x128xf32>
    %cst_12 = arith.constant dense<0.000000e+00> : vector<16x128xf32>
    %17 = tpu.matmul %14, %16, %cst_12 {dimension_numbers = #tpu.dot_dimension_numbers<[1], [1], [0], [0], [0, 0, 1, 0], [], []>} : vector<16x128xf32>, vector<128x128xf32>, vector<16x128xf32> -> vector<16x128xf32>
    %18 = arith.addf %15, %17 : vector<16x128xf32>
    %c0_13 = arith.constant 0 : index
    %c0_14 = arith.constant 0 : index
    %19 = vector.load %arg7[%c0_13, %c0_14] : memref<16x128xf32, #tpu.memory_space<vmem>>, vector<16x128xf32>
    tpu.vector_store %arg7[%c0_13, %c0_14], %18 {strides = array<i32>} : memref<16x128xf32, #tpu.memory_space<vmem>>, vector<16x128xf32>,
    %c0_i32_15 = arith.constant 0 : i32
    %20 = arith.cmpi eq, %arg1, %c0_i32_15 : i32
    %21 = arith.extui %20 : i1 to i32
    %c0_i32_16 = arith.constant 0 : i32
    %22 = arith.cmpi ne, %21, %c0_i32_16 : i32
    scf.if %22 {
      %c0_17 = arith.constant 0 : index
      %c0_18 = arith.constant 0 : index
      %23 = vector.load %arg7[%c0_17, %c0_18] : memref<16x128xf32, #tpu.memory_space<vmem>>, vector<16x128xf32>
      %c0_19 = arith.constant 0 : index
      %c0_20 = arith.constant 0 : index
      %24 = vector.load %arg6[%c0_19, %c0_20] : memref<16x128xf32, #tpu.memory_space<vmem>>, vector<16x128xf32>
      tpu.vector_store %arg6[%c0_19, %c0_20], %23 {strides = array<i32>} : memref<16x128xf32, #tpu.memory_space<vmem>>, vector<16x128xf32>,
    } else {
    }
    return
  }
  func.func @transform_0(%arg0: i32, %arg1: i32) -> (i32, i32) {
    %c0_i32 = arith.constant 0 : i32
    %c0_i32_0 = arith.constant 0 : i32
    return %arg0, %c0_i32 : i32, i32
  }
  func.func @transform_1(%arg0: i32, %arg1: i32) -> (i32, i32) {
    %c0_i32 = arith.constant 0 : i32
    %c0_i32_0 = arith.constant 0 : i32
    return %arg1, %c0_i32 : i32, i32
  }
  func.func @transform_2(%arg0: i32, %arg1: i32) -> (i32, i32) {
    %c0_i32 = arith.constant 0 : i32
    %c0_i32_0 = arith.constant 0 : i32
    return %arg1, %c0_i32 : i32, i32
  }
  func.func @transform_3(%arg0: i32, %arg1: i32) -> (i32, i32) {
    %c0_i32 = arith.constant 0 : i32
    %c0_i32_0 = arith.constant 0 : i32
    return %c0_i32, %arg1 : i32, i32
  }
  func.func @transform_4(%arg0: i32, %arg1: i32) -> (i32, i32) {
    %c0_i32 = arith.constant 0 : i32
    %c0_i32_0 = arith.constant 0 : i32
    return %arg0, %c0_i32 : i32, i32
  }
}

</mosaic_0001>

<bundles_post_ra>
// kernel: tpu_custom_call.1
= control target key start
LH: loop header
LB: loop body
LE: loop exit
PB: predicated region body
PF: predicated region fallthrough
CT: control target
= control target key end

     0   :  { %9 = vsyncpa [#allocation4], 0  ;;  %s913_s0 = inlined_call_operand.hbm [shape: f32[16,128], index: 0, kind: input, shape index: {}]   ;;  %s914_s1 = inlined_call_operand.hbm [shape: f32[128,128], index: 1, kind: input, shape index: {}]   ;;  %s915_s2 = inlined_call_operand.hbm [shape: f32[128,128], index: 2, kind: input, shape index: {}]   ;;  %s916_s3 = inlined_call_operand.hbm [shape: f32[128,128], index: 3, kind: input, shape index: {}]   ;;  %s917_s4 = inlined_call_operand.hbm [shape: f32[16,128], index: 4, kind: output, shape index: {}]  }
   0x1   :  { %10 = vsyncpa [#allocation7], 0 }
   0x2   :  { %11 = vsyncpa [#allocation10], 0 }
   0x3   :  { %12 = vsyncpa [#allocation5], 0  ;;  %s792_s15 = smov [#allocation6]   ;;  %s793_s17 = smov [#allocation3]  }
   0x4   :  { %s30_s16 = sshll.u32 %s792_s15, 4  ;;  %s18_s18 = sshll.u32 %s793_s17, 4  ;;  %s31_s16 = int_to_ptr.vmem [resolvable:$true] %s30_s16  ;;  %s824_s18 = int_to_ptr.vmem [resolvable:$true] %s18_s18 }
   0x5   :  { %s674_s21 = scalar_lea.hbm %s914_s1, 2048 }
   0x6   :  { %p675_p0 = scmp.ne.s32.totalorder %s914_s1, %s674_s21  ;;  %p678_p1 = scmp.lt.u32.totalorder %s674_s21, %s914_s1 }
   0x8   :  { %p680_p2 = pnand %p678_p1, %p675_p0 }
   0xa   :  { %683 = shalt.err (!%p680_p2)
}
   0xb   :  { %s684_s26 = scalar_lea.vmem %s31_s16, 2048  ;;  %p689_p4 = scmp.lt.s32.totalorder %s31_s16, %s31_s16 }
   0xc   :  { %p685_p3 = scmp.ne.s32.totalorder %s31_s16, %s684_s26  ;;  %p690_p5 = scmp.lt.s32.totalorder %s684_s26, %s684_s26 }
   0xe   :  { %p691_p6 = por %p690_p5, %p689_p4 }
  0x10   :  { %p692_p7 = pnand %p691_p6, %p685_p3 }
  0x12   :  { %695 = shalt.err (!%p692_p7)
}
  0x13   :  { %s794_s27 = smov 128   ;;  %s795_s28 = smov 8  }
  0x14   :  { %36 = dma.hbm_to_vmem [thread:$0]  %s914_s1, 2048, %s31_s16, [#allocation7], %s794_s27, %s794_s27, %s795_s28  }
  0x15   :  { %s696_s7 = scalar_lea.hbm %s913_s0, 256 }
  0x16   :  { %p697_p8 = scmp.ne.s32.totalorder %s913_s0, %s696_s7  ;;  %p700_p9 = scmp.lt.u32.totalorder %s696_s7, %s913_s0 }
  0x18   :  { %p702_p10 = pnand %p700_p9, %p697_p8 }
  0x1a   :  { %705 = shalt.err (!%p702_p10)
}
  0x1b   :  { %s706_s12 = scalar_lea.vmem %s824_s18, 256  ;;  %p711_p12 = scmp.lt.s32.totalorder %s824_s18, %s824_s18 }
  0x1c   :  { %p707_p11 = scmp.ne.s32.totalorder %s824_s18, %s706_s12  ;;  %p712_p13 = scmp.lt.s32.totalorder %s706_s12, %s706_s12 }
  0x1e   :  { %p713_p0 = por %p712_p13, %p711_p12 }
  0x20   :  { %p714_p1 = pnand %p713_p0, %p707_p11 }
  0x22   :  { %717 = shalt.err (!%p714_p1)
}
  0x23   :  { %24 = dma.hbm_to_vmem [thread:$0]  %s913_s0, 256, %s824_s18, [#allocation4], %s794_s27, %s794_s27, %s795_s28  }
  0x24   :  { %s796_s14 = smov [#allocation8]   ;;  %s797_s16 = smov [#allocation9]  }
  0x25   :  { %s42_s15 = sshll.u32 %s796_s14, 4  ;;  %s54_s17 = sshll.u32 %s797_s16, 4  ;;  %s43_s15 = int_to_ptr.vmem [resolvable:$true] %s42_s15  ;;  %s861_s17 = int_to_ptr.vmem [resolvable:$true] %s54_s17 }
  0x26   :  { %s718_s21 = scalar_lea.hbm %s915_s2, 2048 }
  0x27   :  { %p719_p2 = scmp.ne.s32.totalorder %s915_s2, %s718_s21  ;;  %p722_p3 = scmp.lt.u32.totalorder %s718_s21, %s915_s2 }
  0x29   :  { %p724_p4 = pnand %p722_p3, %p719_p2 }
  0x2b   :  { %727 = shalt.err (!%p724_p4)
}
  0x2c   :  { %s728_s0 = scalar_lea.vmem %s43_s15, 2048  ;;  %p733_p6 = scmp.lt.s32.totalorder %s43_s15, %s43_s15 }
  0x2d   :  { %p729_p5 = scmp.ne.s32.totalorder %s43_s15, %s728_s0  ;;  %p734_p7 = scmp.lt.s32.totalorder %s728_s0, %s728_s0 }
  0x2f   :  { %p735_p8 = por %p734_p7, %p733_p6 }
  0x31   :  { %p736_p9 = pnand %p735_p8, %p729_p5 }
  0x33   :  { %739 = shalt.err (!%p736_p9)
}
  0x34   :  { %48 = dma.hbm_to_vmem [thread:$0]  %s915_s2, 2048, %s43_s15, [#allocation7], %s794_s27, %s794_s27, %s795_s28  }
  0x35   :  { %s740_s5 = scalar_lea.hbm %s916_s3, 2048 }
  0x36   :  { %p741_p10 = scmp.ne.s32.totalorder %s916_s3, %s740_s5  ;;  %p744_p11 = scmp.lt.u32.totalorder %s740_s5, %s916_s3 }
  0x38   :  { %p746_p12 = pnand %p744_p11, %p741_p10 }
  0x3a   :  { %749 = shalt.err (!%p746_p12)
}
  0x3b   :  { %s750_s10 = scalar_lea.vmem %s861_s17, 2048  ;;  %p755_p0 = scmp.lt.s32.totalorder %s861_s17, %s861_s17 }
  0x3c   :  { %p751_p13 = scmp.ne.s32.totalorder %s861_s17, %s750_s10  ;;  %p756_p1 = scmp.lt.s32.totalorder %s750_s10, %s750_s10 }
  0x3e   :  { %p757_p2 = por %p756_p1, %p755_p0 }
  0x40   :  { %p758_p3 = pnand %p757_p2, %p751_p13 }
  0x42   :  { %761 = shalt.err (!%p758_p3)
}
  0x43   :  { %60 = dma.hbm_to_vmem [thread:$0]  %s916_s3, 2048, %s861_s17, [#allocation10], %s794_s27, %s794_s27, %s795_s28  }
  0x44   :  { %784 = dma.done.wait [#allocation4], 256  }
  0x45   :  { %785 = vsyncadd [#allocation4], 4294967040 }
  0x46   :  { %786 = dma.done.wait [#allocation7], 4096  }
  0x47   :  { %787 = vsyncadd [#allocation7], 4294963200 }
  0x48   :  { %788 = dma.done.wait [#allocation10], 2048  }
  0x49   :  { %789 = vsyncadd [#allocation10], 4294965248  ;;  %v81_v0 = vld [vmem:[#allocation6] sm:$0xff]  ;;  %v82_v1 = vld [vmem:[#allocation6 + $0x8] sm:$0xff]  ;;  %s798_s3 = smov [#allocation11]  }
  0x4a   :  { %v83_v2 = vld [vmem:[#allocation6 + $0x10] sm:$0xff]  ;;  %v563_v3 = vpack.c.bf16 %v82_v1, %v81_v0  ;;  %v84_v4 = vld [vmem:[#allocation6 + $0x18] sm:$0xff]  ;;  %v172_v6 = vld [vmem:[#allocation8] sm:$0xff]  ;;  %s388_s12 = sshll.u32 %s798_s3, 4  ;;  %s389_s12 = int_to_ptr.vmem [resolvable:$true] %s388_s12 }
  0x4b   :  { %v567_v5 = vpack.c.bf16 %v84_v4, %v83_v2  ;;  %v173_v7 = vld [vmem:[#allocation8 + $0x8] sm:$0xff]  ;;  %v174_v9 = vld [vmem:[#allocation8 + $0x10] sm:$0xff]  ;;  %v175_v10 = vld [vmem:[#allocation8 + $0x18] sm:$0xff]  ;;  %s762_s1 = scalar_lea.vmem %s389_s12, 256  ;;  %p767_p5 = scmp.lt.s32.totalorder %s389_s12, %s389_s12 }
  0x4c   :  { %564 = vmatprep.subr.bf16.mxu0 %v563_v3  ;;  %v595_v8 = vpack.c.bf16 %v173_v7, %v172_v6  ;;  %v599_v11 = vpack.c.bf16 %v175_v10, %v174_v9  ;;  %v85_v12 = vld [vmem:[#allocation6 + $0x20] sm:$0xff]  ;;  %v86_v13 = vld [vmem:[#allocation6 + $0x28] sm:$0xff]  ;;  %v79_v14 = vld [vmem:[#allocation3] sm:$0xff]  ;;  %p763_p4 = scmp.ne.s32.totalorder %s389_s12, %s762_s1  ;;  %p768_p6 = scmp.lt.s32.totalorder %s762_s1, %s762_s1 }
  0x4d   :  { %566 = vmatpush3.bf16.xpose.msra.mxu0 %v563_v3  ;;  %v571_v15 = vpack.c.bf16 %v86_v13, %v85_v12  ;;  %v176_v16 = vld [vmem:[#allocation8 + $0x20] sm:$0xff]  ;;  %v177_v17 = vld [vmem:[#allocation8 + $0x28] sm:$0xff]  ;;  %490 = vmatprep.mubr.f32.mxu0 %v79_v14  ;;  %v87_v19 = vld [vmem:[#allocation6 + $0x30] sm:$0xff] }
  0x4e   :  { %568 = vmatprep.subr.bf16.mxu0 %v567_v5  ;;  %596 = vmatprep.subr.bf16.mxu1 %v595_v8  ;;  %v603_v18 = vpack.c.bf16 %v177_v17, %v176_v16  ;;  %v88_v20 = vld [vmem:[#allocation6 + $0x38] sm:$0xff]  ;;  %v178_v22 = vld [vmem:[#allocation8 + $0x30] sm:$0xff]  ;;  %v89_v25 = vld [vmem:[#allocation6 + $0x40] sm:$0xff]  ;;  %p769_p7 = por %p768_p6, %p767_p5 }
  0x4f   :  { %598 = vmatpush3.bf16.xpose.msra.mxu1 %v595_v8  ;;  %525 = vmatprep.mubr.f32.mxu1 %v79_v14  ;;  %v575_v21 = vpack.c.bf16 %v88_v20, %v87_v19  ;;  %v179_v23 = vld [vmem:[#allocation8 + $0x38] sm:$0xff]  ;;  %v90_v26 = vld [vmem:[#allocation6 + $0x48] sm:$0xff]  ;;  %v180_v28 = vld [vmem:[#allocation8 + $0x40] sm:$0xff] }
  0x50   :  { %600 = vmatprep.subr.bf16.mxu1 %v599_v11  ;;  %v607_v24 = vpack.c.bf16 %v179_v23, %v178_v22  ;;  %v579_v27 = vpack.c.bf16 %v90_v26, %v89_v25  ;;  %v181_v29 = vld [vmem:[#allocation8 + $0x48] sm:$0xff]  ;;  %v91_v31 = vld [vmem:[#allocation6 + $0x50] sm:$0xff]  ;;  %v92_v32 = vld [vmem:[#allocation6 + $0x58] sm:$0xff]  ;;  %p770_p8 = pnand %p769_p7, %p763_p4 }
  0x51   :  { %v611_v30 = vpack.c.bf16 %v181_v29, %v180_v28  ;;  %v583_v33 = vpack.c.bf16 %v92_v32, %v91_v31  ;;  %v182_v34 = vld [vmem:[#allocation8 + $0x50] sm:$0xff]  ;;  %v183_v35 = vld [vmem:[#allocation8 + $0x58] sm:$0xff]  ;;  %v93_v37 = vld [vmem:[#allocation6 + $0x60] sm:$0xff] }
  0x52   :  { %v615_v36 = vpack.c.bf16 %v183_v35, %v182_v34  ;;  %v94_v38 = vld [vmem:[#allocation6 + $0x68] sm:$0xff]  ;;  %v184_v40 = vld [vmem:[#allocation8 + $0x60] sm:$0xff]  ;;  %v95_v43 = vld [vmem:[#allocation6 + $0x70] sm:$0xff] }
  0x53   :  { %v587_v39 = vpack.c.bf16 %v94_v38, %v93_v37  ;;  %v185_v41 = vld [vmem:[#allocation8 + $0x68] sm:$0xff]  ;;  %v96_v44 = vld [vmem:[#allocation6 + $0x78] sm:$0xff]  ;;  %v186_v46 = vld [vmem:[#allocation8 + $0x70] sm:$0xff] }
  0x54   :  { %v619_v42 = vpack.c.bf16 %v185_v41, %v184_v40  ;;  %v591_v45 = vpack.c.bf16 %v96_v44, %v95_v43  ;;  %v187_v47 = vld [vmem:[#allocation8 + $0x78] sm:$0xff]  ;;  %v281_v49 = vld [vmem:[#allocation9] sm:$0xff]  ;;  %v282_v50 = vld [vmem:[#allocation9 + $0x8] sm:$0xff] }
  0x55   :  { %570 = vmatpush3.bf16.xpose.msra.mxu0 %v567_v5  ;;  %v623_v48 = vpack.c.bf16 %v187_v47, %v186_v46  ;;  %v627_v51 = vpack.c.bf16 %v282_v50, %v281_v49  ;;  %v283_v52 = vld [vmem:[#allocation9 + $0x10] sm:$0xff]  ;;  %v284_v53 = vld [vmem:[#allocation9 + $0x18] sm:$0xff]  ;;  %v285_v56 = vld [vmem:[#allocation9 + $0x20] sm:$0xff] }
  0x56   :  { %572 = vmatprep.subr.bf16.mxu0 %v571_v15  ;;  %v80_v54 = vld [vmem:[#allocation3 + $0x8] sm:$0xff]  ;;  %v631_v55 = vpack.c.bf16 %v284_v53, %v283_v52  ;;  %v286_v57 = vld [vmem:[#allocation9 + $0x28] sm:$0xff]  ;;  %v287_v59 = vld [vmem:[#allocation9 + $0x30] sm:$0xff] }
  0x57   :  { %602 = vmatpush3.bf16.xpose.msra.mxu1 %v599_v11  ;;  %v635_v58 = vpack.c.bf16 %v286_v57, %v285_v56  ;;  %v288_v60 = vld [vmem:[#allocation9 + $0x38] sm:$0xff]  ;;  %v289_v62 = vld [vmem:[#allocation9 + $0x40] sm:$0xff]  ;;  %v290_v63 = vld [vmem:[#allocation9 + $0x48] sm:$0xff] }
  0x58   :  { %604 = vmatprep.subr.bf16.mxu1 %v603_v18  ;;  %v639_v61 = vpack.c.bf16 %v288_v60, %v287_v59  ;;  %v643_v0 = vpack.c.bf16 %v290_v63, %v289_v62  ;;  %v291_v1 = vld [vmem:[#allocation9 + $0x50] sm:$0xff]  ;;  %v292_v2 = vld [vmem:[#allocation9 + $0x58] sm:$0xff]  ;;  %v293_v4 = vld [vmem:[#allocation9 + $0x60] sm:$0xff] }
  0x59   :  { %v647_v3 = vpack.c.bf16 %v292_v2, %v291_v1  ;;  %v294_v5 = vld [vmem:[#allocation9 + $0x68] sm:$0xff]  ;;  %v295_v7 = vld [vmem:[#allocation9 + $0x70] sm:$0xff]  ;;  %v296_v8 = vld [vmem:[#allocation9 + $0x78] sm:$0xff] }
  0x5a   :  { %v651_v6 = vpack.c.bf16 %v294_v5, %v293_v4  ;;  %v655_v9 = vpack.c.bf16 %v296_v8, %v295_v7 }
  0x5d   :  { %574 = vmatpush3.bf16.xpose.msra.mxu0 %v571_v15 }
  0x5e   :  { %576 = vmatprep.subr.bf16.mxu0 %v575_v21 }
  0x5f   :  { %606 = vmatpush3.bf16.xpose.msra.mxu1 %v603_v18 }
  0x60   :  { %608 = vmatprep.subr.bf16.mxu1 %v607_v24 }
  0x65   :  { %578 = vmatpush3.bf16.xpose.msra.mxu0 %v575_v21 }
  0x66   :  { %580 = vmatprep.subr.bf16.mxu0 %v579_v27 }
  0x67   :  { %610 = vmatpush3.bf16.xpose.msra.mxu1 %v607_v24 }
  0x68   :  { %612 = vmatprep.subr.bf16.mxu1 %v611_v30 }
  0x6d   :  { %582 = vmatpush3.bf16.xpose.msra.mxu0 %v579_v27 }
  0x6e   :  { %584 = vmatprep.subr.bf16.mxu0 %v583_v33 }
  0x6f   :  { %614 = vmatpush3.bf16.xpose.msra.mxu1 %v611_v30 }
  0x70   :  { %616 = vmatprep.subr.bf16.mxu1 %v615_v36 }
  0x75   :  { %586 = vmatpush3.bf16.xpose.msra.mxu0 %v583_v33 }
  0x76   :  { %588 = vmatprep.subr.bf16.mxu0 %v587_v39 }
  0x77   :  { %618 = vmatpush3.bf16.xpose.msra.mxu1 %v615_v36 }
  0x78   :  { %620 = vmatprep.subr.bf16.mxu1 %v619_v42 }
  0x7d   :  { %590 = vmatpush3.bf16.xpose.msra.mxu0 %v587_v39 }
  0x7e   :  { %592 = vmatprep.subr.bf16.mxu0 %v591_v45 }
  0x7f   :  { %622 = vmatpush3.bf16.xpose.msra.mxu1 %v619_v42 }
  0x80   :  { %624 = vmatprep.subr.bf16.mxu1 %v623_v48 }
  0x85   :  { %594 = vmatpush3.bf16.xpose.msra.mxu0 %v591_v45 }
  0x86   :  { %628 = vmatprep.subr.bf16.mxu0 %v627_v51 }
  0x87   :  { %626 = vmatpush3.bf16.xpose.msra.mxu1 %v623_v48 }
  0x8c   :  { %491 = vmatmul.mubr.f32.vlgmr.msra.gmra.mrb[0].mxu0 %v80_v54 }
  0x8d   :  { %630 = vmatpush3.bf16.xpose.msra.mxu0 %v627_v51 }
  0x8e   :  { %632 = vmatprep.subr.bf16.mxu0 %v631_v55  ;;  %526 = vmatmul.mubr.f32.vlgmr.msra.gmra.mrb[0].mxu1 %v80_v54 }
  0x95   :  { %634 = vmatpush3.bf16.xpose.msra.mxu0 %v631_v55 }
  0x96   :  { %636 = vmatprep.subr.bf16.mxu0 %v635_v58 }
  0x9d   :  { %638 = vmatpush3.bf16.xpose.msra.mxu0 %v635_v58 }
  0x9e   :  { %640 = vmatprep.subr.bf16.mxu0 %v639_v61 }
  0xa5   :  { %642 = vmatpush3.bf16.xpose.msra.mxu0 %v639_v61 }
  0xa6   :  { %644 = vmatprep.subr.bf16.mxu0 %v643_v0 }
  0xad   :  { %646 = vmatpush3.bf16.xpose.msra.mxu0 %v643_v0 }
  0xae   :  { %648 = vmatprep.subr.bf16.mxu0 %v647_v3 }
  0xb5   :  { %650 = vmatpush3.bf16.xpose.msra.mxu0 %v647_v3 }
  0xb6   :  { %652 = vmatprep.subr.bf16.mxu0 %v651_v6 }
  0xbd   :  { %654 = vmatpush3.bf16.xpose.msra.mxu0 %v651_v6 }
  0xbe   :  { %656 = vmatprep.subr.bf16.mxu0 %v655_v9 }
  0xc5   :  { %658 = vmatpush3.bf16.xpose.msra.mxu0 %v655_v9 }
 0x15f   :  { %v492_v10 = vpop.f32.mrb[0].mxu0 }
 0x160   :  { %v403_v11 = vmul.f32 -1.442695, %v492_v10  ;;  %v163_v12 = vpop.f32.mrb[1].mxu0 }
 0x161   :  { %v402_v13 = vmul.f32 -1.442695, %v163_v12  ;;  %v527_v14 = vpop.f32.mrb[0].mxu1 }
 0x162   :  { %666 = vpow2.f32 %v403_v11  ;;  %v254_v15 = vpop.f32.mrb[1].mxu1 }
 0x163   :  { %668 = vpow2.f32 %v402_v13 }
 0x16c   :  { %v667_v16 = vpop.eup %666 }
 0x16d   :  { %v669_v17 = vpop.eup %668  ;;  %v270_v18 = vadd.f32 1.0, %v667_v16 }
 0x16e   :  { %v269_v19 = vadd.f32 1.0, %v669_v17 }
 0x16f   :  { %670 = vrcp.f32 %v270_v18 }
 0x170   :  { %672 = vrcp.f32 %v269_v19 }
 0x179   :  { %v671_v20 = vpop.eup %670 }
 0x17a   :  { %v673_v21 = vpop.eup %672  ;;  %v276_v22 = vmul.f32 %v671_v20, %v492_v10 }
 0x17b   :  { %v275_v23 = vmul.f32 %v673_v21, %v163_v12 }
 0x17c   :  { %v278_v24 = vmul.f32 %v527_v14, %v276_v22 }
 0x17d   :  { %v277_v25 = vmul.f32 %v275_v23, %v254_v15 }
 0x17f   :  { %560 = vmatprep.mubr.f32.mxu0 %v277_v25 }
 0x180   :  { %561 = vmatmul.mubr.f32.vlgmr.msra.gmra.mrb[2].mxu0 %v278_v24 }
 0x253   :  { %v562_v26 = vpop.f32.mrb[2].mxu0 }
 0x254   :  { %382 = vst [vmem:[#allocation11 + $0x8] sm:$0xff] %v562_v26  ;;  %v363_v27 = vpop.f32.mrb[3].mxu0 }
 0x255   :  { %381 = vst [vmem:[#allocation11] sm:$0xff] %v363_v27 }
 0x256   :  { %773 = shalt.err (!%p770_p8)
}
 0x257   :  { %s774_s15 = scalar_lea.hbm %s917_s4, 256 }
 0x258   :  { %p775_p9 = scmp.ne.s32.totalorder %s917_s4, %s774_s15  ;;  %p778_p10 = scmp.lt.u32.totalorder %s774_s15, %s917_s4 }
 0x25a   :  { %p780_p11 = pnand %p778_p10, %p775_p9 }
 0x25c   :  { %783 = shalt.err (!%p780_p11)
}
 0x25d   :  { %394 = dma.vmem_to_hbm [thread:$0]  %s389_s12, 256, %s917_s4, [#allocation5], %s794_s27, %s794_s27, %s795_s28  }
 0x25e   :  { %790 = dma.done.wait [#allocation5], 256  }
 0x25f   :  { %791 = vsyncadd [#allocation5], 4294967040 }
 0x260   :  { %398 = vsyncpa [#allocation4], 1 }
 0x261   :  { %399 = vsyncpa [#allocation7], 1 }
 0x262   :  { %400 = vsyncpa [#allocation10], 1 }
 0x263   :  { %401 = vsyncpa [#allocation5], 1 }

</bundles_post_ra>
